<compile_context>
chip_gen: v6e
topology: v6e:2x2x1
jax: 0.10.0
libtpu: 0.0.40
codegen_flags: <defaults>
</compile_context>

<pallas_src>
import functools

import jax
import jax.numpy as jnp
from jax import lax
from jax.experimental import pallas as pl
from jax.experimental.pallas import tpu as pltpu


def _d1_matmul_kernel(x_ref, w_ref, b_ref, o_ref, *, nb, H, K, NO):
    # x_ref: (nb, H, K)   K  = (W+2)*Cin   bottom-row input slabs
    # w_ref: (K, NO)      NO = W*Cout      block-Toeplitz masked weights
    # b_ref: (1, NO)                       bias tiled along W (f32)
    # o_ref: (nb, H, NO)                   lane-dense output
    lhs = x_ref[...].reshape(nb * H, K)
    acc = jnp.dot(lhs, w_ref[...], preferred_element_type=jnp.float32)
    acc = acc + b_ref[...]                      # (1, NO) broadcasts over rows
    o_ref[...] = acc.reshape(nb, H, NO).astype(o_ref.dtype)


def d1_prepare_params(weight_oihw, bias, W, compute_dtype=jnp.float32):
    """One-time (per weight update) prep: mask + block-Toeplitz expansion.

    Returns (big_w, b_row) with big_w: ((W+2)*Cin, W*Cout), b_row: (1, W*Cout).
    Hoisted out of the per-call path: the gather + transposes + reshape here
    cost more than the Pallas kernel itself at small sizes.
    """
    Cout, Cin = weight_oihw.shape[0], weight_oihw.shape[1]
    Wp = W + 2
    K = Wp * Cin
    NO = W * Cout

    mask = jnp.array([[0., 0., 0.], [0., 0., 0.], [1., 1., 1.]],
                     dtype=weight_oihw.dtype)
    w_masked = weight_oihw * mask[None, None, :, :]            # (Cout, Cin, 3, 3)
    w_taps = jnp.transpose(w_masked[:, :, 2, :], (2, 1, 0))    # (kw=3, Cin, Cout)

    off = jnp.arange(Wp)[:, None] - jnp.arange(W)[None, :]     # (Wp, W): wp - w
    valid = (off >= 0) & (off <= 2)
    kw_idx = jnp.clip(off, 0, 2)
    big = w_taps[kw_idx] * valid[:, :, None, None].astype(w_taps.dtype)
    # (Wp, W, Cin, Cout) -> (Wp, Cin, W, Cout) -> (K, NO)
    big_w = jnp.transpose(big, (0, 2, 1, 3)).reshape(K, NO).astype(compute_dtype)
    b_row = jnp.tile(bias.astype(jnp.float32), W).reshape(1, NO)
    return big_w, b_row


def _choose_batch_fold(N, H, K, NO, itemsize):
    """Images per grid step.

    Targets nb*H ~ 512 rows per step (amortize ~0.35us/step overhead and fill
    the MXU M dimension), capped so the double-buffered in+out slabs stay
    under ~12 MiB (below v5e's 16 MiB default scoped VMEM; trivially safe on
    v6e's 128 MiB and v7x's 64 MiB).  Remainder batches are handled with one
    zero-padded step rather than falling back to nb=1.
    """
    TARGET_ROWS = 512
    nb = max(1, min(N, -(-TARGET_ROWS // H)))                  # ceil
    VMEM_BUDGET = 12 * 1024 * 1024
    per_img_bytes = H * (K + NO) * max(int(itemsize), 1)
    nb = max(1, min(nb, VMEM_BUDGET // (2 * per_img_bytes)))
    n_pad = (-(-N // nb)) * nb                                 # round N up to nb
    return nb, n_pad


@jax.jit
def d1_forward(x_nchw, big_w, b_row):
    """Forward pass of D1.  x: NCHW; big_w/b_row from d1_prepare_params."""
    N, Cin, H, W = x_nchw.shape
    K, NO = big_w.shape
    Cout = NO // W

    # Output row h only reads padded input row h+2, i.e. x rows 1..H-1 plus a
    # zero row; pad W by 1 on each side and flatten (W+2, Cin) into lanes.
    x_nhwc = jnp.transpose(x_nchw, (0, 2, 3, 1))               # (N, H, W, Cin)
    x_rows = jnp.pad(x_nhwc[:, 1:, :, :],
                     ((0, 0), (0, 1), (1, 1), (0, 0)))         # (N, H, Wp, Cin)
    x_slab = x_rows.reshape(N, H, K).astype(big_w.dtype)

    nb, n_pad = _choose_batch_fold(N, H, K, NO, big_w.dtype.itemsize)
    if n_pad != N:
        x_slab = jnp.pad(x_slab, ((0, n_pad - N), (0, 0), (0, 0)))
    grid = (n_pad // nb,)

    kernel = functools.partial(_d1_matmul_kernel, nb=nb, H=H, K=K, NO=NO)

    out_flat = pl.pallas_call(
        kernel,
        out_shape=jax.ShapeDtypeStruct((n_pad, H, NO), x_nchw.dtype),
        grid_spec=pl.GridSpec(
            grid=grid,
            in_specs=[
                pl.BlockSpec((nb, H, K), lambda i: (i, 0, 0)),
                pl.BlockSpec((K, NO), lambda i: (0, 0)),    # resident weights
                pl.BlockSpec((1, NO), lambda i: (0, 0)),    # resident bias
            ],
            out_specs=pl.BlockSpec((nb, H, NO), lambda i: (i, 0, 0)),
        ),
        compiler_params=pltpu.CompilerParams(
            dimension_semantics=("parallel",)),
    )(x_slab, big_w, b_row)

    out_nhwc = out_flat[:N].reshape(N, H, W, Cout)
    return jnp.transpose(out_nhwc, (0, 3, 1, 2))               # NHWC -> NCHW


if __name__ == "__main__":
    # D1(in_ch=4, out_ch=8) on x of shape (2, 4, 16, 16)
    in_ch, out_ch = 4, 8
    N, H, W = 2, 16, 16

    key = jax.random.PRNGKey(0)
    k_x, k_w, k_b = jax.random.split(key, 3)
    x = jax.random.normal(k_x, (N, in_ch, H, W), dtype=jnp.float32)
    weight = jax.random.normal(k_w, (out_ch, in_ch, 3, 3), dtype=jnp.float32) * 0.1
    bias = jax.random.normal(k_b, (out_ch,), dtype=jnp.float32) * 0.1

    # Weight prep once (per weight update), NOT per forward call.
    # For v6e/v7x throughput at large batch, pass compute_dtype=jnp.bfloat16.
    big_w, b_row = d1_prepare_params(weight, bias, W, compute_dtype=jnp.float32)

    y = d1_forward(x, big_w, b_row)
    y = jax.block_until_ready(y)

    # Reference: XLA conv with the same masked weights.
    mask = jnp.array([[0., 0., 0.], [0., 0., 0.], [1., 1., 1.]],
                     dtype=jnp.float32)
    w_masked = weight * mask[None, None, :, :]
    y_ref = lax.conv_general_dilated(
        x, w_masked, window_strides=(1, 1),
        padding=[(1, 1), (1, 1)],
        dimension_numbers=("NCHW", "OIHW", "NCHW"),
    ) + bias[None, :, None, None]

    assert y.shape == (N, out_ch, H, W), y.shape
    assert jnp.allclose(y, y_ref, atol=1e-4, rtol=1e-4), float(
        jnp.max(jnp.abs(y - y_ref)))

    # Also exercise the odd-batch padded-step path for correctness.
    x3 = jax.random.normal(key, (3, in_ch, H, W), dtype=jnp.float32)
    y3 = jax.block_until_ready(d1_forward(x3, big_w, b_row))
    y3_ref = lax.conv_general_dilated(
        x3, w_masked, window_strides=(1, 1), padding=[(1, 1), (1, 1)],
        dimension_numbers=("NCHW", "OIHW", "NCHW"),
    ) + bias[None, :, None, None]
    assert jnp.allclose(y3, y3_ref, atol=1e-4, rtol=1e-4), float(
        jnp.max(jnp.abs(y3 - y3_ref)))

    print("KERNEL_OK")
</pallas_src>

<mosaic_0001>
module attributes {stable_mosaic.version = 11 : i64} {
  func.func @_d1_matmul_kernel(%arg0: i32, %arg1: memref<2x16x72xf32, #tpu.memory_space<vmem>>, %arg2: memref<72x128xf32, #tpu.memory_space<vmem>>, %arg3: memref<1x128xf32, #tpu.memory_space<vmem>>, %arg4: memref<2x16x128xf32, #tpu.memory_space<vmem>>) attributes {dimension_semantics = [#tpu.dimension_semantics<parallel>], iteration_bounds = array<i64: 1>, scalar_prefetch = 0 : i64, scratch_operands = 0 : i64, tpu.core_type = #tpu.core_type<tc>, window_params = [{transform_indices = @transform_0, window_bounds = array<i64: 2, 16, 72>}, {pipeline_mode = #tpu.pipeline_mode<synchronous>, transform_indices = @transform_1, window_bounds = array<i64: 72, 128>}, {pipeline_mode = #tpu.pipeline_mode<synchronous>, transform_indices = @transform_2, window_bounds = array<i64: 1, 128>}, {transform_indices = @transform_3, window_bounds = array<i64: 2, 16, 128>}]} {
    %c0 = arith.constant 0 : index
    %c0_0 = arith.constant 0 : index
    %c0_1 = arith.constant 0 : index
    %0 = vector.load %arg1[%c0, %c0_0, %c0_1] : memref<2x16x72xf32, #tpu.memory_space<vmem>>, vector<2x16x72xf32>
    %1 = vector.shape_cast %0 : vector<2x16x72xf32> to vector<32x72xf32>
    %c0_2 = arith.constant 0 : index
    %c0_3 = arith.constant 0 : index
    %2 = vector.load %arg2[%c0_2, %c0_3] : memref<72x128xf32, #tpu.memory_space<vmem>>, vector<72x128xf32>
    %cst = arith.constant dense<0.000000e+00> : vector<32x128xf32>
    %3 = tpu.matmul %1, %2, %cst {dimension_numbers = #tpu.dot_dimension_numbers<[1], [0], [0], [1], [0, 0, 1, 1], [], []>} : vector<32x72xf32>, vector<72x128xf32>, vector<32x128xf32> -> vector<32x128xf32>
    %c0_4 = arith.constant 0 : index
    %c0_5 = arith.constant 0 : index
    %4 = vector.load %arg3[%c0_4, %c0_5] : memref<1x128xf32, #tpu.memory_space<vmem>>, vector<1x128xf32>
    %5 = vector.broadcast %4 : vector<1x128xf32> to vector<32x128xf32>
    %6 = arith.addf %3, %5 : vector<32x128xf32>
    %7 = vector.shape_cast %6 : vector<32x128xf32> to vector<2x16x128xf32>
    %c0_6 = arith.constant 0 : index
    %c0_7 = arith.constant 0 : index
    %c0_8 = arith.constant 0 : index
    %8 = vector.load %arg4[%c0_6, %c0_7, %c0_8] : memref<2x16x128xf32, #tpu.memory_space<vmem>>, vector<2x16x128xf32>
    tpu.vector_store %arg4[%c0_6, %c0_7, %c0_8], %7 {strides = array<i32>} : memref<2x16x128xf32, #tpu.memory_space<vmem>>, vector<2x16x128xf32>,
    return
  }
  func.func @transform_0(%arg0: i32) -> (i32, i32, i32) {
    %c0_i32 = arith.constant 0 : i32
    %c0_i32_0 = arith.constant 0 : i32
    %c0_i32_1 = arith.constant 0 : i32
    return %arg0, %c0_i32, %c0_i32_0 : i32, i32, i32
  }
  func.func @transform_1(%arg0: i32) -> (i32, i32) {
    %c0_i32 = arith.constant 0 : i32
    %c0_i32_0 = arith.constant 0 : i32
    %c0_i32_1 = arith.constant 0 : i32
    return %c0_i32, %c0_i32_0 : i32, i32
  }
  func.func @transform_2(%arg0: i32) -> (i32, i32) {
    %c0_i32 = arith.constant 0 : i32
    %c0_i32_0 = arith.constant 0 : i32
    %c0_i32_1 = arith.constant 0 : i32
    return %c0_i32, %c0_i32_0 : i32, i32
  }
  func.func @transform_3(%arg0: i32) -> (i32, i32, i32) {
    %c0_i32 = arith.constant 0 : i32
    %c0_i32_0 = arith.constant 0 : i32
    %c0_i32_1 = arith.constant 0 : i32
    return %arg0, %c0_i32, %c0_i32_0 : i32, i32, i32
  }
}

</mosaic_0001>

<bundles_post_ra>
// kernel: d1_forward.1
= control target key start
LH: loop header
LB: loop body
LE: loop exit
PB: predicated region body
PF: predicated region fallthrough
CT: control target
= control target key end

     0   :  { %vm34_vm0 = vcmask 588800   ;;  %s274_s1 = inlined_call_operand.vmem [shape: f32[72,128], index: 1, kind: input, shape index: {}]   ;;  %s275_s0 = inlined_call_operand.vmem [shape: f32[2,16,72], index: 0, kind: input, shape index: {}]   ;;  %s276_s2 = inlined_call_operand.vmem [shape: f32[1,128], index: 2, kind: input, shape index: {}]   ;;  %s277_s3 = inlined_call_operand.vmem [shape: f32[2,16,128], index: 3, kind: output, shape index: {}]  }
   0x1   :  { %v26_v0 = vld [vmem:[%s274_s1 + $0x40] sm:$0xff]  ;;  %v25_v1 = vld [vmem:[%s274_s1 + $0x38] sm:$0xff]  ;;  %v24_v2 = vld [vmem:[%s274_s1 + $0x30] sm:$0xff] }
   0x2   :  { %158 = vmatprep.subr.mxu0 %v26_v0  ;;  %182 = vmatprep.subr.mxu1 %v26_v0  ;;  %v23_v3 = vld [vmem:[%s274_s1 + $0x28] sm:$0xff]  ;;  %v22_v4 = vld [vmem:[%s274_s1 + $0x20] sm:$0xff]  ;;  %v21_v5 = vld [vmem:[%s274_s1 + $0x18] sm:$0xff] }
   0x3   :  { %159 = vmatpush3.msra.mxu0 %v26_v0  ;;  %191 = vmatpush3.msra.mxu1 %v26_v0  ;;  %v20_v6 = vld [vmem:[%s274_s1 + $0x10] sm:$0xff]  ;;  %v19_v7 = vld [vmem:[%s274_s1 + $0x8] sm:$0xff]  ;;  %v18_v8 = vld [vmem:[%s274_s1] sm:$0xff] }
   0x4   :  { %160 = vmatprep.subr.mxu0 %v25_v1  ;;  %183 = vmatprep.subr.mxu1 %v25_v1  ;;  %v14_v9 = vld [vmem:[%s275_s0] sm:$0xff]  ;;  %v16_v10 = vld [vmem:[%s275_s0 + $0x10] sm:$0xff]  ;;  %v15_v11 = vld [vmem:[%s275_s0 + $0x8] sm:$0xff] }
   0x5   :  { %161 = vmatpush3.msra.mxu0 %v25_v1  ;;  %192 = vmatpush3.msra.mxu1 %v25_v1  ;;  %v17_v12 = vld [vmem:[%s275_s0 + $0x18] sm:$0xff]  ;;  %v140_v13 = vld [vmem:[%s276_s2] ss:$0 sm:$0xff] }
   0x6   :  { %162 = vmatprep.subr.mxu0 %v24_v2  ;;  %184 = vmatprep.subr.mxu1 %v24_v2 }
   0x7   :  { %163 = vmatpush3.msra.mxu0 %v24_v2  ;;  %193 = vmatpush3.msra.mxu1 %v24_v2 }
   0x8   :  { %164 = vmatprep.subr.mxu0 %v23_v3  ;;  %185 = vmatprep.subr.mxu1 %v23_v3 }
   0x9   :  { %165 = vmatpush3.msra.mxu0 %v23_v3  ;;  %194 = vmatpush3.msra.mxu1 %v23_v3 }
   0xa   :  { %166 = vmatprep.subr.mxu0 %v22_v4  ;;  %186 = vmatprep.subr.mxu1 %v22_v4 }
   0xb   :  { %167 = vmatpush3.msra.mxu0 %v22_v4  ;;  %195 = vmatpush3.msra.mxu1 %v22_v4 }
   0xc   :  { %168 = vmatprep.subr.mxu0 %v21_v5  ;;  %187 = vmatprep.subr.mxu1 %v21_v5 }
   0xd   :  { %169 = vmatpush3.msra.mxu0 %v21_v5  ;;  %196 = vmatpush3.msra.mxu1 %v21_v5 }
   0xe   :  { %170 = vmatprep.subr.mxu0 %v20_v6  ;;  %188 = vmatprep.subr.mxu1 %v20_v6 }
   0xf   :  { %171 = vmatpush3.msra.mxu0 %v20_v6  ;;  %197 = vmatpush3.msra.mxu1 %v20_v6 }
  0x10   :  { %172 = vmatprep.subr.mxu0 %v19_v7  ;;  %189 = vmatprep.subr.mxu1 %v19_v7 }
  0x11   :  { %173 = vmatpush3.msra.mxu0 %v19_v7  ;;  %198 = vmatpush3.msra.mxu1 %v19_v7 }
  0x12   :  { %174 = vmatprep.subr.mxu0 %v18_v8  ;;  %190 = vmatprep.subr.mxu1 %v18_v8 }
  0x13   :  { %175 = vmatpush3.msra.mxu0 %v18_v8  ;;  %199 = vmatpush3.msra.mxu1 %v18_v8 }
  0x14   :  { %176 = vmatprep.mubr.msk.f32.mxu0 %vm34_vm0, %v14_v9  ;;  %179 = vmatprep.mubr.msk.f32.mxu1 %vm34_vm0, %v16_v10 }
  0x15   :  { %177 = vmatmul.mubr.msk.f32.vlgmr.msra.gmra.mxu0 %vm34_vm0, %v15_v11  ;;  %180 = vmatmul.mubr.msk.f32.vlgmr.msra.gmra.mxu1 %vm34_vm0, %v17_v12 }
  0xd5   :  { %v178_v14 = vpop.f32.mrf.mxu0  ;;  %v181_v15 = vpop.f32.mrf.mxu1 }
  0xd6   :  { %v119_v16 = vadd.f32 %v178_v14, %v140_v13  ;;  %v129_v17 = vadd.f32 %v181_v15, %v140_v13 }
  0xd7   :  { %v113_v18 = vpop.f32.mrf.mxu0  ;;  %v123_v19 = vpop.f32.mrf.mxu1 }
  0xd8   :  { %133 = vst [vmem:[%s277_s3 + $0x8] sm:$0xff] %v119_v16  ;;  %135 = vst [vmem:[%s277_s3 + $0x18] sm:$0xff] %v129_v17  ;;  %v114_v20 = vadd.f32 %v140_v13, %v113_v18  ;;  %v124_v21 = vadd.f32 %v140_v13, %v123_v19 }
  0xda   :  { %132 = vst [vmem:[%s277_s3] sm:$0xff] %v114_v20  ;;  %134 = vst [vmem:[%s277_s3 + $0x10] sm:$0xff] %v124_v21 }

</bundles_post_ra>
